<compile_context>
chip_gen: v7x
topology: tpu7x:2x2x1
jax: 0.10.0
libtpu: 0.0.40
codegen_flags: <defaults>
</compile_context>

<pallas_src>
import math
import numpy as np
import jax
import jax.numpy as jnp
from jax.scipy.linalg import cho_solve
from jax.experimental import pallas as pl
from jax.experimental.pallas import tpu as pltpu

N_DIM = 8          # n_dim of the distribution (module default is 2; kept small)
NUM_SAMPLES = 16   # num_samples drawn in forward()
LOC_VAL = 0.0      # module default loc
SCALE_VAL = 1.0    # module default scale  -> Sig = eye + 1.0 (SPD)


def _mvg_forward_kernel(eps_ref, l_ref, siginv_ref, loc_ref, const_ref, z_ref, logp_ref):
    """Fused sample + log_prob:
         zc    = eps @ L^T                      (N, D)   centered samples
         z     = zc + loc                       (N, D)
         quad  = diag( (zc Sig^-1) zc^T )       (1, N)   Mahalanobis term, lane-dense
         log_p = -0.5*quad - const              (1, N)
       const = 0.5*(n_dim*log(2*pi) + logdet(Sig)) is a precomputed SMEM scalar.
    """
    eps = eps_ref[...]                                            # (N, D)
    L = l_ref[...]                                                # (D, D) lower Cholesky of Sig

    # zc = eps @ L^T : contract eps' feature axis with L's column axis.
    zc = jax.lax.dot_general(eps, L, (((1,), (1,)), ((), ())),
                             preferred_element_type=jnp.float32)  # (N, D)
    z_ref[...] = zc + loc_ref[...]                                # broadcast (1, D) -> (N, D)

    y = jnp.dot(zc, siginv_ref[...], preferred_element_type=jnp.float32)   # (N, D)

    # Diagonal of G = Y Zc^T gives the quadratic form; extracting it with a
    # sublane reduce writes log_p lane-dense as (1, N) with no transpose.
    G = jax.lax.dot_general(y, zc, (((1,), (1,)), ((), ())),
                            preferred_element_type=jnp.float32)    # (N, N)
    n = G.shape[0]
    row = jax.lax.broadcasted_iota(jnp.int32, (n, n), 0)
    col = jax.lax.broadcasted_iota(jnp.int32, (n, n), 1)
    quad = jnp.sum(jnp.where(row == col, G, 0.0), axis=0, keepdims=True)   # (1, N)

    logp_ref[...] = -0.5 * quad - const_ref[0]


def multivariate_gaussian_forward(eps, loc, cov):
    """Equivalent of MultivariateGaussian.forward given pre-drawn eps ~ N(0, I)."""
    n, d = eps.shape

    # ---- parameter-only precompute (eps-independent, hoisted out of hot path) ----
    # TODO(synk): Cholesky / triangular solve have no clean Pallas equivalent; they
    # depend only on (loc, scale), so they run once per parameter update in plain JAX.
    L = jnp.linalg.cholesky(cov.astype(jnp.float32))                         # (D, D) lower
    sig_inv = cho_solve((L, True), jnp.eye(d, dtype=jnp.float32))            # (D, D)
    logdet = 2.0 * jnp.sum(jnp.log(jnp.diagonal(L)))
    const = (0.5 * (d * math.log(2.0 * math.pi) + logdet)).reshape((1,)).astype(jnp.float32)

    z, logp_row = pl.pallas_call(
        _mvg_forward_kernel,
        out_shape=(
            jax.ShapeDtypeStruct((n, d), jnp.float32),   # z
            jax.ShapeDtypeStruct((1, n), jnp.float32),   # log_p (lane-dense, batch on lanes)
        ),
        in_specs=[
            pl.BlockSpec(memory_space=pltpu.MemorySpace.VMEM),  # eps
            pl.BlockSpec(memory_space=pltpu.MemorySpace.VMEM),  # L
            pl.BlockSpec(memory_space=pltpu.MemorySpace.VMEM),  # Sig^-1
            pl.BlockSpec(memory_space=pltpu.MemorySpace.VMEM),  # loc (1, D)
            pl.BlockSpec(memory_space=pltpu.MemorySpace.SMEM),  # const scalar
        ],
        out_specs=(
            pl.BlockSpec(memory_space=pltpu.MemorySpace.VMEM),
            pl.BlockSpec(memory_space=pltpu.MemorySpace.VMEM),
        ),
    )(
        eps.astype(jnp.float32),
        L,
        sig_inv,
        loc.reshape(1, d).astype(jnp.float32),
        const,
    )

    return z, logp_row[0]


def _reference_forward(eps, loc, cov):
    """Pure-JAX replica of MultivariateNormal sample + log_prob (correctness check)."""
    d = cov.shape[0]
    L = jnp.linalg.cholesky(cov)
    z = loc[None, :] + eps @ L.T
    diff = z - loc[None, :]
    quad = jnp.sum(diff * jnp.linalg.solve(cov, diff.T).T, axis=1)
    logdet = 2.0 * jnp.sum(jnp.log(jnp.diagonal(L)))
    log_p = -0.5 * (quad + d * np.log(2.0 * np.pi) + logdet)
    return z, log_p


if __name__ == "__main__":
    key = jax.random.PRNGKey(0)

    # Parameter construction mirroring MultivariateGaussian.__init__
    # (f32 instead of torch.double — TPU-native dtype).
    loc = jnp.zeros((N_DIM,), dtype=jnp.float32) + LOC_VAL
    cov = jnp.eye(N_DIM, dtype=jnp.float32) + SCALE_VAL          # full SPD covariance

    # eps ~ N(0, I) stands in for the RNG inside self.mvn.sample([num_samples]).
    eps = jax.random.normal(key, (NUM_SAMPLES, N_DIM), dtype=jnp.float32)

    z, log_p = multivariate_gaussian_forward(eps, loc, cov)
    jax.block_until_ready(z)
    jax.block_until_ready(log_p)

    z_ref, log_p_ref = _reference_forward(eps, loc, cov)
    np.testing.assert_allclose(np.asarray(z), np.asarray(z_ref), rtol=1e-5, atol=1e-5)
    np.testing.assert_allclose(np.asarray(log_p), np.asarray(log_p_ref), rtol=1e-4, atol=1e-4)

    print("KERNEL_OK")
</pallas_src>

<mosaic_0001>
module attributes {stable_mosaic.version = 11 : i64} {
  func.func @_mvg_forward_kernel(%arg0: memref<16x8xf32, #tpu.memory_space<vmem>>, %arg1: memref<8x8xf32, #tpu.memory_space<vmem>>, %arg2: memref<8x8xf32, #tpu.memory_space<vmem>>, %arg3: memref<1x8xf32, #tpu.memory_space<vmem>>, %arg4: memref<1xf32, #tpu.memory_space<smem>>, %arg5: memref<16x8xf32, #tpu.memory_space<vmem>>, %arg6: memref<1x16xf32, #tpu.memory_space<vmem>>) attributes {dimension_semantics = [], scalar_prefetch = 0 : i64, scratch_operands = 0 : i64, tpu.core_type = #tpu.core_type<tc>} {
    %c0 = arith.constant 0 : index
    %c0_0 = arith.constant 0 : index
    %0 = vector.load %arg0[%c0, %c0_0] : memref<16x8xf32, #tpu.memory_space<vmem>>, vector<16x8xf32>
    %c0_1 = arith.constant 0 : index
    %c0_2 = arith.constant 0 : index
    %1 = vector.load %arg1[%c0_1, %c0_2] : memref<8x8xf32, #tpu.memory_space<vmem>>, vector<8x8xf32>
    %cst = arith.constant dense<0.000000e+00> : vector<16x8xf32>
    %2 = tpu.matmul %0, %1, %cst {dimension_numbers = #tpu.dot_dimension_numbers<[1], [1], [0], [0], [0, 0, 1, 0], [], []>} : vector<16x8xf32>, vector<8x8xf32>, vector<16x8xf32> -> vector<16x8xf32>
    %c0_3 = arith.constant 0 : index
    %c0_4 = arith.constant 0 : index
    %3 = vector.load %arg3[%c0_3, %c0_4] : memref<1x8xf32, #tpu.memory_space<vmem>>, vector<1x8xf32>
    %4 = vector.broadcast %3 : vector<1x8xf32> to vector<16x8xf32>
    %5 = arith.addf %2, %4 : vector<16x8xf32>
    %c0_5 = arith.constant 0 : index
    %c0_6 = arith.constant 0 : index
    %6 = vector.load %arg5[%c0_5, %c0_6] : memref<16x8xf32, #tpu.memory_space<vmem>>, vector<16x8xf32>
    tpu.vector_store %arg5[%c0_5, %c0_6], %5 {strides = array<i32>} : memref<16x8xf32, #tpu.memory_space<vmem>>, vector<16x8xf32>,
    %c0_7 = arith.constant 0 : index
    %c0_8 = arith.constant 0 : index
    %7 = vector.load %arg2[%c0_7, %c0_8] : memref<8x8xf32, #tpu.memory_space<vmem>>, vector<8x8xf32>
    %cst_9 = arith.constant dense<0.000000e+00> : vector<16x8xf32>
    %8 = tpu.matmul %2, %7, %cst_9 {dimension_numbers = #tpu.dot_dimension_numbers<[1], [0], [0], [1], [0, 0, 1, 1], [], []>} : vector<16x8xf32>, vector<8x8xf32>, vector<16x8xf32> -> vector<16x8xf32>
    %cst_10 = arith.constant dense<0.000000e+00> : vector<16x16xf32>
    %9 = tpu.matmul %8, %2, %cst_10 {dimension_numbers = #tpu.dot_dimension_numbers<[1], [1], [0], [0], [0, 0, 1, 0], [], []>} : vector<16x8xf32>, vector<16x8xf32>, vector<16x16xf32> -> vector<16x16xf32>
    %10 = tpu.iota {dimensions = array<i32: 0>} : vector<16x16xi32>
    %11 = tpu.iota {dimensions = array<i32: 1>} : vector<16x16xi32>
    %12 = arith.cmpi eq, %10, %11 : vector<16x16xi32>
    %cst_11 = arith.constant 0.000000e+00 : f32
    %13 = vector.broadcast %cst_11 : f32 to vector<16x16xf32>
    %14 = arith.select %12, %9, %13 : vector<16x16xi1>, vector<16x16xf32>
    %cst_12 = arith.constant dense<0.000000e+00> : vector<16xf32>
    %15 = vector.multi_reduction <add>, %14, %cst_12 [0] : vector<16x16xf32> to vector<16xf32>
    %16 = vector.shape_cast %15 : vector<16xf32> to vector<1x16xf32>
    %cst_13 = arith.constant -5.000000e-01 : f32
    %17 = vector.broadcast %cst_13 : f32 to vector<1x16xf32>
    %18 = arith.mulf %17, %16 : vector<1x16xf32>
    %c0_14 = arith.constant 0 : index
    %19 = memref.load %arg4[%c0_14] : memref<1xf32, #tpu.memory_space<smem>>
    %20 = vector.broadcast %19 : f32 to vector<1x16xf32>
    %21 = arith.subf %18, %20 : vector<1x16xf32>
    %c0_15 = arith.constant 0 : index
    %c0_16 = arith.constant 0 : index
    %22 = vector.load %arg6[%c0_15, %c0_16] : memref<1x16xf32, #tpu.memory_space<vmem>>, vector<1x16xf32>
    tpu.vector_store %arg6[%c0_15, %c0_16], %21 {strides = array<i32>} : memref<1x16xf32, #tpu.memory_space<vmem>>, vector<1x16xf32>,
    return
  }
}

</mosaic_0001>

<bundles_post_ra>
// kernel: tpu_custom_call.1
= control target key start
LH: loop header
LB: loop body
LE: loop exit
PB: predicated region body
PF: predicated region fallthrough
CT: control target
= control target key end

     0   :  { %vm27_vm0 = vcmask 64512   ;;  %s481_s0 = inlined_call_operand.vmem [shape: f32[16,8], index: 0, kind: input, shape index: {}]   ;;  %s482_s1 = inlined_call_operand.vmem [shape: f32[8,8], index: 1, kind: input, shape index: {}]   ;;  %s483_s2 = inlined_call_operand.vmem [shape: f32[8,8], index: 2, kind: input, shape index: {}]   ;;  %s484_s3 = inlined_call_operand.vmem [shape: f32[1,8], index: 3, kind: input, shape index: {}]   ;;  %s485_s4 = inlined_call_operand.<no memory space> [shape: f32[1], index: 4, kind: input, shape index: {}]   ;;  %s486_s5 = inlined_call_operand.vmem [shape: f32[16,8], index: 5, kind: output, shape index: {0}]   ;;  %s487_s6 = inlined_call_operand.hbm [shape: f32[1,16], index: 6, kind: output, shape index: {1}]  }
   0x1   :  { %v26_v0 = vld [vmem:[%s482_s1] sm:$0xff] }
   0x2   :  { %v24_v1 = vld [vmem:[%s481_s0] sm:$0xff]  ;;  %349 = vmatprep.subr.msk.mxu0 %vm27_vm0, %v26_v0 }
   0x3   :  { %351 = vmatprep.mubr.msk.f32.mxu0 %vm27_vm0, %v24_v1  ;;  %v123_v2 = vld [vmem:[%s483_s2] sm:$0xff] }
   0x4   :  { %13 = vsyncpa [#allocation4], 0  ;;  %350 = vmatpush3.xpose.msk.msra.mxu0 %vm27_vm0, %v26_v0  ;;  %v25_v3 = vld [vmem:[%s481_s0 + $0x8] sm:$0xff]  ;;  %v332_v4 = vld [vmem:[%s484_s3] ss:$0 sm:$0xff]  ;;  %v286_v12 = vlaneseq  ;;  %vm295_vm3 = vcmask 130048   ;;  %v307_v29 = vstv %s485_s4 }
   0x5   :  { %354 = vmatprep.subr.mxu0 %v123_v2  ;;  %vm367_vm1 = vmpackc.low %vm27_vm0, %vm27_vm0  ;;  %s397_s8 = smov [#allocation3]   ;;  %vm309_vm5 = vcmask 122880  }
   0x6   :  { %v287_v13 = vshrl.u32 %v286_v12, 7  ;;  %v290_v15 = vand.u32 127, %v286_v12  ;;  %s319_s9 = sshll.u32 %s397_s8, 4  ;;  %s320_s9 = int_to_ptr.vmem [resolvable:$true] %s319_s9 }
   0x7   :  { %352 = vmatmul.mubr.msk.f32.vlgmr.msra.gmra.mrb[0].mxu0 %vm27_vm0, %v25_v3  ;;  %s373_s10 = scalar_lea.vmem %s320_s9, 16  ;;  %s377_s11 = scalar_lea.vmem %s320_s9, 32 }
   0x8   :  { %355 = vmatpush3.msra.mxu0 %v123_v2  ;;  %v288_v14 = vadd.s32 8, %v287_v13  ;;  %vm291_vm4 = vcmp.eq.s32.totalorder %v287_v13, %v290_v15  ;;  %p374_p0 = scmp.ne.s32.totalorder %s320_s9, %s373_s10  ;;  %p378_p1 = scmp.lt.s32.totalorder %s320_s9, %s320_s9 }
   0x9   :  { %p379_p2 = scmp.lt.s32.totalorder %s377_s11, %s373_s10 }
   0xa   :  { %vm292_vm2 = vcmp.eq.s32.totalorder %v288_v14, %v290_v15 }
   0xb   :  { %p380_p3 = por %p379_p2, %p378_p1 }
   0xd   :  { %p381_p4 = pnand %p380_p3, %p374_p0 }
  0xda   :  { %v353_v5 = vpop.f32.mrb[0].mxu0 }
  0xdb   :  { %v120_v6 = vadd.f32 %v353_v5, %v332_v4  ;;  %v103_v7 = vpop.f32.mrb[1].mxu0 }
  0xdc   :  { %v119_v8 = vadd.f32 %v332_v4, %v103_v7  ;;  %356 = vmatprep.mubr.msk.f32.mxu0 %vm27_vm0, %v103_v7  ;;  %v366_v9 = vpack.c.bf16 %v353_v5, %v103_v7 }
  0xdd   :  { %122 = vst.msk [vmem:[%s486_s5 + $0x8] sm:$0xff] %vm27_vm0, %v120_v6  ;;  %357 = vmatmul.mubr.msk.f32.vlgmr.msra.gmra.mrb[2].mxu0 %vm27_vm0, %v353_v5 }
  0xde   :  { %121 = vst.msk [vmem:[%s486_s5] sm:$0xff] %vm27_vm0, %v119_v8  ;;  %368 = vmatprep.subr.msk.bf16.mxu1 %vm367_vm1, %v366_v9 }
  0xdf   :  { %371 = vmatpush3.bf16.xpose.msk.msra.mxu1 %vm367_vm1, %v366_v9 }
 0x1b0   :  { %v358_v10 = vpop.f32.mrb[2].mxu0 }
 0x1b1   :  { %v196_v11 = vpop.f32.mrb[3].mxu0 }
 0x1b2   :  { %363 = vmatprep.mubr.msk.f32.mxu1 %vm27_vm0, %v196_v11 }
 0x1b3   :  { %364 = vmatmul.mubr.msk.f32.vlgmr.msra.gmra.mrb[0].mxu1 %vm27_vm0, %v358_v10 }
 0x286   :  { %v365_v16 = vpop.f32.mrb[0].mxu1 }
 0x287   :  { %v294_v17 = vsel %vm292_vm2, %v365_v16, 0.0  ;;  %v277_v18 = vpop.f32.mrb[1].mxu1 }
 0x288   :  { %v297_v19 = vsel %vm295_vm3, %v294_v17, 0.0  ;;  %v293_v20 = vsel %vm291_vm4, %v277_v18, 0.0 }
 0x289   :  { %v296_v21 = vsel %vm295_vm3, %v293_v20, 0.0 }
 0x28a   :  { %v298_v22 = vadd.f32 %v297_v19, %v296_v21 }
 0x28c   :  { %v299_v23 = vrot.slane %v298_v22, 4 }
 0x28e   :  { %v300_v24 = vadd.f32 %v299_v23, %v298_v22 }
 0x290   :  { %v301_v25 = vrot.slane %v300_v24, 2 }
 0x292   :  { %v302_v26 = vadd.f32 %v301_v25, %v300_v24 }
 0x294   :  { %v303_v27 = vrot.slane %v302_v26, 1 }
 0x296   :  { %v304_v28 = vadd.f32 %v303_v27, %v302_v26 }
 0x298   :  { %v305_v30 = vmul.f32 -0.5, %v304_v28 }
 0x29a   :  { %v308_v31 = vsub.f32 %v305_v30, %v307_v29 }
 0x29c   :  { %310 = vst.msk [vmem:[#allocation3] sm:$0x1] %vm309_vm5, %v308_v31 }
 0x29d   :  { %384 = shalt.err (!%p381_p4)
}
 0x29e   :  { %s385_s14 = scalar_lea.hbm %s487_s6, 16 }
 0x29f   :  { %p386_p5 = scmp.ne.s32.totalorder %s487_s6, %s385_s14  ;;  %p389_p6 = scmp.lt.u32.totalorder %s385_s14, %s487_s6 }
 0x2a1   :  { %p391_p7 = pnand %p389_p6, %p386_p5 }
 0x2a3   :  { %394 = shalt.err (!%p391_p7)
}
 0x2a4   :  { %322 = dma.vmem_to_hbm [thread:$0]  %s320_s9, 16, %s487_s6, [#allocation4]  }
 0x2a5   :  { %395 = dma.done.wait [#allocation4], 16  }
 0x2a6   :  { %396 = vsyncadd [#allocation4], 4294967280 }
 0x2a7   :  { %328 = vsyncpa [#allocation4], 1 }

</bundles_post_ra>
